<compile_context>
chip_gen: v6e
topology: v6e:2x2x1
jax: 0.10.0
libtpu: 0.0.40
codegen_flags: <defaults>
</compile_context>

<pallas_src>
import functools

import jax
import jax.numpy as jnp
from jax.experimental import pallas as pl
from jax.experimental.pallas import tpu as pltpu

LANE = 128


def _conv1x1_bias_kernel(x_ref, w_ref, b_ref, o_ref):
    # x_ref: (Cin, tile_s)  spatial-on-lanes block of the NCHW input
    # w_ref: (Cout, Cin)    b_ref: (Cout, 1)
    # o_ref: (Cout, tile_s) lane-dense, unpadded NCHW conv-output block
    acc = jnp.dot(w_ref[...], x_ref[...], preferred_element_type=jnp.float32)
    o_ref[...] = (acc + b_ref[...]).astype(o_ref.dtype)


def _pick_tile_s(S, N, *, target, min_total_steps=8):
    """Pick the lane tile over the flattened H*W axis.

    Must be a multiple of 128 that divides S (or S itself). Prefer the largest
    tile <= target (amortizes per-step overhead), but shrink while it leaves
    fewer than `min_total_steps` grid steps so v7x's two TensorCores each get
    at least a couple of pipelined steps (>=2/core keeps DMA overlapped).
    """
    if S % LANE != 0:
        return S  # full-extent block is always legal
    divisors = [d for d in range(LANE, S + 1, LANE) if S % d == 0]
    tile = max([d for d in divisors if d <= target] or [LANE])
    while tile > LANE and N * (S // tile) < min_total_steps:
        smaller = [d for d in divisors if d < tile]
        if not smaller:
            break
        tile = max(smaller)
    return tile


@functools.partial(jax.jit, static_argnames=("scale_factor", "tile_target"))
def upsample_forward(x_nchw, weight, bias, *, scale_factor, tile_target=16384):
    """Equivalent of Upsample.forward (1x1 Conv2d + PixelShuffle), NCHW in / NCHW out."""
    N, Cin, H, W = x_nchw.shape
    Cout, Cin_w, KH, KW = weight.shape
    r = scale_factor
    assert Cin == Cin_w and KH == 1 and KW == 1, "Upsample uses a 1x1 conv, groups=1"
    assert Cout == Cin * r * r, "conv out channels must be in_feat * r^2 for PixelShuffle"

    S = H * W
    # NCHW is already (N, Cin, H*W)-contiguous: these reshapes are free (no
    # transpose / extra HBM pass over the input).
    x3d = x_nchw.reshape(N, Cin, S)
    w2d = weight.reshape(Cout, Cin)
    b2d = bias.reshape(Cout, 1)

    dtype_bytes = jnp.dtype(x_nchw.dtype).itemsize
    # Keep double-buffered (x tile + out tile) well inside the 32 MiB scoped
    # VMEM limit (v7x has only 64 MiB physical VMEM per TensorCore).
    vmem_budget = 24 * 1024 * 1024
    cap = max(LANE, (vmem_budget // (2 * (Cin + Cout) * dtype_bytes)) // LANE * LANE)
    tile_s = _pick_tile_s(S, N, target=min(tile_target, cap))
    grid = (N, S // tile_s)

    cost = pl.CostEstimate(
        flops=2 * N * S * Cin * Cout,
        transcendentals=0,
        bytes_accessed=dtype_bytes * (N * S * Cin + Cout * Cin + Cout + N * S * Cout),
    )

    # NOTE: K = Cin is tiny here; the kernel is HBM-bound so MXU fill doesn't
    # matter. If Cin grows into the hundreds, add a K grid axis + f32 VMEM
    # accumulator with pl.when init/finalize.
    out3d = pl.pallas_call(
        _conv1x1_bias_kernel,
        out_shape=jax.ShapeDtypeStruct((N, Cout, S), x_nchw.dtype),
        grid_spec=pltpu.PrefetchScalarGridSpec(
            num_scalar_prefetch=0,
            grid=grid,
            in_specs=[
                pl.BlockSpec((None, Cin, tile_s), lambda n, s: (n, 0, s)),
                # Grid-invariant operands: single-buffered to save VMEM headroom.
                pl.BlockSpec((Cout, Cin), lambda n, s: (0, 0),
                             pipeline_mode=pl.Buffered(1)),
                pl.BlockSpec((Cout, 1), lambda n, s: (0, 0),
                             pipeline_mode=pl.Buffered(1)),
            ],
            out_specs=pl.BlockSpec((None, Cout, tile_s), lambda n, s: (n, 0, s)),
        ),
        compiler_params=pltpu.CompilerParams(
            dimension_semantics=("parallel", "parallel"),  # shards across v7x's 2 TCs
            vmem_limit_bytes=32 * 1024 * 1024,
        ),
        cost_estimate=cost,
    )(x3d, w2d, b2d)

    # PixelShuffle(r): conv channel c_out = c*r*r + i*r + j (PyTorch convention).
    # The kernel already emitted the unpadded NCHW conv layout, so only this one
    # XLA transpose pass remains.
    # TODO(synk): fully fusing the shuffle into the kernel's store needs
    # per-element lane interleaving that a BlockSpec index_map cannot express.
    out = out3d.reshape(N, Cin, r, r, H, W)
    out = jnp.transpose(out, (0, 1, 4, 2, 5, 3))
    return out.reshape(N, Cin, H * r, W * r)


if __name__ == "__main__":
    # Small shapes consistent with the module: batch=2, in_feat=4, 16x16 spatial, scale=2.
    N, Cin, H, W, r = 2, 4, 16, 16, 2
    Cout = Cin * r * r

    key = jax.random.PRNGKey(0)
    kx, kw, kb = jax.random.split(key, 3)

    x = jax.random.normal(kx, (N, Cin, H, W), dtype=jnp.float32)

    # Deterministic init mimicking PyTorch Conv2d default uniform bound.
    fan_in = Cin * 1 * 1
    bound = 1.0 / jnp.sqrt(jnp.float32(fan_in))
    weight = jax.random.uniform(kw, (Cout, Cin, 1, 1), jnp.float32, -bound, bound)
    bias = jax.random.uniform(kb, (Cout,), jnp.float32, -bound, bound)

    y = upsample_forward(x, weight, bias, scale_factor=r)
    jax.block_until_ready(y)

    # Reference: XLA conv (1x1) + bias, then PixelShuffle by its NCHW definition.
    y_conv = jax.lax.conv_general_dilated(
        x, weight, window_strides=(1, 1), padding=((0, 0), (0, 0)),
        dimension_numbers=("NCHW", "OIHW", "NCHW"),
    ) + bias[None, :, None, None]
    y_ref = jnp.transpose(
        y_conv.reshape(N, Cin, r, r, H, W), (0, 1, 4, 2, 5, 3)
    ).reshape(N, Cin, H * r, W * r)

    assert y.shape == (N, Cin, H * r, W * r)
    assert jnp.allclose(y, y_ref, rtol=1e-4, atol=1e-4)

    print("KERNEL_OK")
</pallas_src>

<mosaic_0001>
module attributes {stable_mosaic.version = 11 : i64} {
  func.func @_conv1x1_bias_kernel(%arg0: i32, %arg1: i32, %arg2: memref<1x4x128xf32, #tpu.memory_space<vmem>>, %arg3: memref<16x4xf32, #tpu.memory_space<vmem>>, %arg4: memref<16x1xf32, #tpu.memory_space<vmem>>, %arg5: memref<1x16x128xf32, #tpu.memory_space<vmem>>) attributes {dimension_semantics = [#tpu.dimension_semantics<parallel>, #tpu.dimension_semantics<parallel>], iteration_bounds = array<i64: 2, 2>, scalar_prefetch = 0 : i64, scratch_operands = 0 : i64, tpu.core_type = #tpu.core_type<tc>, window_params = [{transform_indices = @transform_0, window_bounds = array<i64: 1, 4, 128>}, {pipeline_mode = #tpu.pipeline_mode<synchronous>, transform_indices = @transform_1, window_bounds = array<i64: 16, 4>}, {pipeline_mode = #tpu.pipeline_mode<synchronous>, transform_indices = @transform_2, window_bounds = array<i64: 16, 1>}, {transform_indices = @transform_3, window_bounds = array<i64: 1, 16, 128>}]} {
    %c0 = arith.constant 0 : index
    %c0_0 = arith.constant 0 : index
    %0 = vector.load %arg3[%c0, %c0_0] : memref<16x4xf32, #tpu.memory_space<vmem>>, vector<16x4xf32>
    %c0_1 = arith.constant 0 : index
    %c0_2 = arith.constant 0 : index
    %c0_3 = arith.constant 0 : index
    %1 = vector.load %arg2[%c0_1, %c0_2, %c0_3] : memref<1x4x128xf32, #tpu.memory_space<vmem>>, vector<1x4x128xf32>
    %2 = vector.shape_cast %1 : vector<1x4x128xf32> to vector<4x128xf32>
    %cst = arith.constant dense<0.000000e+00> : vector<16x128xf32>
    %3 = tpu.matmul %0, %2, %cst {dimension_numbers = #tpu.dot_dimension_numbers<[1], [0], [0], [1], [0, 0, 1, 1], [], []>} : vector<16x4xf32>, vector<4x128xf32>, vector<16x128xf32> -> vector<16x128xf32>
    %c0_4 = arith.constant 0 : index
    %c0_5 = arith.constant 0 : index
    %4 = vector.load %arg4[%c0_4, %c0_5] : memref<16x1xf32, #tpu.memory_space<vmem>>, vector<16x1xf32>
    %5 = vector.broadcast %4 : vector<16x1xf32> to vector<16x128xf32>
    %6 = arith.addf %3, %5 : vector<16x128xf32>
    %c0_6 = arith.constant 0 : index
    %c0_7 = arith.constant 0 : index
    %c0_8 = arith.constant 0 : index
    %7 = vector.load %arg5[%c0_6, %c0_7, %c0_8] : memref<1x16x128xf32, #tpu.memory_space<vmem>>, vector<1x16x128xf32>
    %8 = vector.shape_cast %7 : vector<1x16x128xf32> to vector<16x128xf32>
    %9 = vector.shape_cast %6 : vector<16x128xf32> to vector<1x16x128xf32>
    tpu.vector_store %arg5[%c0_6, %c0_7, %c0_8], %9 {strides = array<i32>} : memref<1x16x128xf32, #tpu.memory_space<vmem>>, vector<1x16x128xf32>,
    return
  }
  func.func @transform_0(%arg0: i32, %arg1: i32) -> (i32, i32, i32) {
    %c0_i32 = arith.constant 0 : i32
    %c0_i32_0 = arith.constant 0 : i32
    return %arg0, %c0_i32, %arg1 : i32, i32, i32
  }
  func.func @transform_1(%arg0: i32, %arg1: i32) -> (i32, i32) {
    %c0_i32 = arith.constant 0 : i32
    %c0_i32_0 = arith.constant 0 : i32
    %c0_i32_1 = arith.constant 0 : i32
    return %c0_i32, %c0_i32_0 : i32, i32
  }
  func.func @transform_2(%arg0: i32, %arg1: i32) -> (i32, i32) {
    %c0_i32 = arith.constant 0 : i32
    %c0_i32_0 = arith.constant 0 : i32
    %c0_i32_1 = arith.constant 0 : i32
    return %c0_i32, %c0_i32_0 : i32, i32
  }
  func.func @transform_3(%arg0: i32, %arg1: i32) -> (i32, i32, i32) {
    %c0_i32 = arith.constant 0 : i32
    %c0_i32_0 = arith.constant 0 : i32
    return %arg0, %c0_i32, %arg1 : i32, i32, i32
  }
}

</mosaic_0001>

<bundles_post_ra>
// kernel: upsample_forward.1
= control target key start
LH: loop header
LB: loop body
LE: loop exit
PB: predicated region body
PF: predicated region fallthrough
CT: control target
= control target key end

     0   :  { %s570_s12 = smov 0   ;;  %s572_s13 = smov 0   ;;  %s679_s0 = inlined_call_operand.vmem [shape: f32[2,4,256], index: 0, kind: input, shape index: {}]   ;;  %s680_s1 = inlined_call_operand.vmem [shape: f32[16,4], index: 1, kind: input, shape index: {}]   ;;  %s681_s2 = inlined_call_operand.vmem [shape: f32[16,1], index: 2, kind: input, shape index: {}]   ;;  %s682_s3 = inlined_call_operand.vmem [shape: f32[2,16,256], index: 3, kind: output, shape index: {}]  }
   0x1   :  { %s574_s14 = smov 0   ;;  %s576_s15 = smov 0  }
   0x2   :  { %s578_s16 = smov 0   ;;  %s580_s17 = smov 0  }
   0x3   :  { %s582_s18 = smov 0  }
   0x4 LB: > { %s22_s19 = sadd.s32 1, %s539_s16  ;;  %s25_s20 = sadd.s32 1, %s543_s17  ;;  %s547_s18 = sphi %s582_s18, %s13_s18   ;;  %s543_s17 = sphi %s580_s17, %s689_s17   ;;  %s539_s16 = sphi %s578_s16, %s688_s16   ;;  %s535_s15 = sphi %s576_s15, %s687_s15   ;;  %s531_s14 = sphi %s574_s14, %s686_s14   ;;  %s527_s13 = sphi %s572_s13, %s685_s13   ;;  %s523_s12 = sphi %s570_s12, %s684_s12  }
   0x5   : > { %p23_p0 = scmp.ge.s32.totalorder %s22_s19, 2  ;;  %s411_s21 = sadd.s32 4294967295, %s547_s18  }
   0x6   : > { %p114_p1 = scmp.ne.s32.totalorder %s527_s13, %s523_s12  ;;  %p115_p2 = scmp.eq.s32.totalorder %s411_s21, 3 }
   0x7   : > { %s691_s19 = smov (%p23_p0, %s22_s19), 0  ;;  %s693_s20 = smov (!%p23_p0, %s25_s20), %s543_s17 }
   0x8   : > { %s100_s22 = ssub.s32 %s539_s16, %s691_s19  ;;  %p27_p3 = scmp.ge.s32.totalorder %s693_s20, 2 }
   0x9   : > { %p415_p4 = scmp.ge.s32.totalorder %s547_s18, 1  ;;  %p616_p5 = por %p115_p2, %p114_p1 }
   0xa   : > { %p156_p6 = scmp.lt.s32.totalorder %s547_s18, 5  ;;  %s695_s20 = smov (%p27_p3, %s693_s20), 0 }
   0xb   : > { %s99_s24 = ssub.s32 %s543_s17, %s695_s20  ;;  %s104_s26 = sadd.s32 1, %s527_s13 }
   0xc   : > { %p157_p7 = pnand %p415_p4, %p156_p6  ;;  %s101_s25 = sor.u32 %s100_s22, %s99_s24 }
   0xd   : > { %p102_p8 = scmp.eq.s32.totalorder %s101_s25, 0  ;;  %p182_p9 = scmp.lt.s32.totalorder (!%p157_p7), %s535_s15, 1 }
   0xe   : > { %160 = sbr.rel (%p157_p7) target bundleno = 234 (0xea), region = 32  ;;  %p184_p10 = scmp.lt.s32.totalorder (!%p157_p7), %s531_s14, 1 }
   0xf   : > { %s627_s27 = scalar_select %p102_p8, %s527_s13, %s104_s26  }
  0x10   : > { %s179_s28 = sand.u32 (!%p157_p7), 1, %s523_s12  }
  0x11   : > { %s416_s29 = sshll.u32 (!%p157_p7), %s179_s28, 4 }
  0x12   : > { %s181_s30 = scalar_lea.vmem (!%p157_p7), [#allocation2], %s416_s29 }
  0x13   : > { %v190_v0 = vld [vmem:[%s680_s1] sm:$0xff]  ;;  %vm205_vm0 = vcmask 31744   ;;  %s183_s5 = scalar_select %p182_p9, %s535_s15, 1  ;;  %v549_v2 = vmov 0   ;;  %v194_v3 = vld [vmem:[%s681_s2 + $0x8] sm:$0xff]  ;;  %vm212_vm1 = vcmask 1043456  }
  0x14   : > { %432 = vmatprep.mubr.msk.f32.mxu0 %vm205_vm0, %v190_v0  ;;  %v193_v1 = vld [vmem:[%s681_s2] sm:$0xff]  ;;  %492 = vset.pattern.permute.xlu0 %v549_v2  ;;  %s185_s6 = scalar_select %p184_p10, %s531_s14, 1  ;;  %v191_v5 = vld [vmem:[%s680_s1 + $0x8] sm:$0xff] }
  0x15   : > { %197 = vperm.xlu0 %492, %v193_v1   ;;  %s417_s7 = sshll.u32 %s183_s5, 1  ;;  %s423_s4 = sshll.u32 (%p616_p5), %s535_s15, 2 }
  0x16   : > { %s187_s10 = sadd.s32 %s417_s7, %s185_s6  ;;  %s301_s5 = sadd.s32 (%p616_p5), %s531_s14, %s423_s4 }
  0x17   : > { %s418_s11 = sshll.u32 %s187_s10, 2  ;;  %s424_s6 = sshll.u32 (%p616_p5), %s301_s5, 3 }
  0x18   : > { %s189_s24 = scalar_lea.vmem %s679_s0, %s418_s11  ;;  %s303_s8 = scalar_lea.vmem (%p616_p5), %s682_s3, %s424_s6 }
  0x19   : > { %202 = vperm.xlu0 %492, %v194_v3   ;;  %v192_v4 = vld [vmem:[%s189_s24] sm:$0xf] }
  0x1a   : > { %430 = vmatprep.subr.msk.mxu0 %vm212_vm1, %v192_v4 }
  0x1b   : > { %431 = vmatpush3.msk.msra.mxu0 %vm212_vm1, %v192_v4 }
  0x1c   : > { %433 = vmatmul.mubr.msk.f32.vlgmr.msra.gmra.mxu0 %vm205_vm0, %v191_v5 }
  0x90   : > { %v198_v6 = vpop.permute.xlu0 %197 }
  0x94   : > { %v203_v7 = vpop.permute.xlu0 %202 }
  0xdc   : > { %v434_v8 = vpop.f32.mrf.mxu0 }
  0xdd   : > { %v288_v9 = vadd.f32 %v434_v8, %v203_v7  ;;  %299 = sbr.rel (!%p616_p5) target bundleno = 234 (0xea), region = 36 }
  0xde   : > { %v282_v10 = vpop.f32.mrf.mxu0 }
  0xdf   : > { %292 = vst [vmem:[%s181_s30 + $0x8] sm:$0xff] %v288_v9  ;;  %v283_v11 = vadd.f32 %v282_v10, %v198_v6 }
  0xe1   : > { %291 = vst [vmem:[%s181_s30] sm:$0xff] %v283_v11 }
  0xe6   : > { %v336_v13 = vld [vmem:[%s181_s30 + $0x8] sm:$0xff] }
  0xe7   : > { %337 = vst [vmem:[%s303_s8 + $0x10] sm:$0xff] %v336_v13 }
  0xe8   : > { %v334_v12 = vld [vmem:[%s181_s30] sm:$0xff] }
  0xe9   : > { %335 = vst [vmem:[%s303_s8] sm:$0xff] %v334_v12 }
  0xea PF: > { %s13_s18 = sadd.s32 1, %s547_s18   ;;  %s684_s12 = smov %s527_s13 }
  0xeb   : > { %p10_p11 = scmp.ge.s32.totalorder %s13_s18, 6   ;;  %s685_s13 = smov %s627_s27 }
  0xec   : > { %s686_s14 = smov %s539_s16  ;;  %s687_s15 = smov %s543_s17 }
  0xed   : > { %s688_s16 = smov %s691_s19  ;;  %s689_s17 = smov %s695_s20 }
  0xee   :  { %12 = sbr.rel (!%p10_p11) target bundleno = 4 (0x4), region = 100 }

</bundles_post_ra>
